<compile_context>
chip_gen: v7x
topology: tpu7x:2x2x1
jax: 0.10.0
libtpu: 0.0.40
codegen_flags: <defaults>
</compile_context>

<pallas_src>
import functools

import jax
import jax.numpy as jnp
from jax.experimental import pallas as pl
from jax.experimental.pallas import tpu as pltpu


_VMEM_PLAN = 40 * 1024 * 1024      # conservative per-TensorCore planning budget
_VMEM_CAP = 56 * 1024 * 1024       # scoped-VMEM cap (safe on v7x 64 MiB/TC)


def _round_up(v, m):
    return ((v + m - 1) // m) * m


def _maybe_pad(a, widths):
    if all(lo == 0 and hi == 0 for lo, hi in widths):
        return a
    return jnp.pad(a, widths)


def _pick_tm(n):
    """Batch tile: multiple of 16 (bf16 sublane tile), small padded-row waste."""
    if n <= 16:
        return 16
    limit = _round_up(n, 16)
    for cand in (512, 256, 128, 64, 32, 16):
        if cand > limit:
            continue
        waste = _round_up(n, cand) - n
        if waste <= max(n // 8, 16):
            return cand
    return 16


def _vmem_estimate(tm, d_pad, tn, grid_j, x_bytes):
    """Rough per-stage VMEM need: weight buffers + double-buffered tiles."""
    w_buf = 1 if grid_j == 1 else 2
    w_tile = d_pad * tn * 2 * w_buf                 # bf16 weight block(s)
    vecs = 8 * d_pad * 4                            # 1-row params (generous)
    stage1 = (w_tile + vecs
              + 2 * tm * d_pad * x_bytes            # x tile (double-buffered)
              + 2 * tm * tn * 2                     # h1 out tile (bf16)
              + 4 * tn * 4)                         # stat partials
    stage2 = (w_tile + vecs
              + 2 * tm * d_pad * 2                  # h1 in tile (bf16)
              + 2 * tm * tn * x_bytes               # residual tile
              + 2 * tm * tn * x_bytes)              # out tile
    return max(stage1, stage2)


# --------------------------------------------------------------------------
# Stage 1: LayerNorm + Linear1 + partial BatchNorm statistics (per tile).
# --------------------------------------------------------------------------
def _stage1_kernel(x_ref, ln_g_ref, ln_b_ref, w1_ref, b1_ref,
                   h1_ref, ssum_ref, ssq_ref,
                   *, d_real, tm, n_real, n_pad):
    x = x_ref[...].astype(jnp.float32)                     # (TM, Dp)

    # LayerNorm over the real feature width, one-pass statistics.
    # Padded lanes of x are zero, so they do not perturb the sums; padded
    # lanes of ln_g/ln_b are zero, so those lanes come out exactly zero.
    inv_d = 1.0 / d_real
    s = jnp.sum(x, axis=-1, keepdims=True)
    sq = jnp.sum(x * x, axis=-1, keepdims=True)
    mu = s * inv_d
    var = jnp.maximum(sq * inv_d - mu * mu, 0.0)
    h = (x - mu) * jax.lax.rsqrt(var + 1e-5)
    h = h * ln_g_ref[...] + ln_b_ref[...]

    # Linear1 on the MXU (bf16 inputs, f32 accumulation).
    h1 = jnp.dot(h.astype(jnp.bfloat16), w1_ref[...],
                 preferred_element_type=jnp.float32) + b1_ref[...]

    # Store the intermediate in bf16 (halves HBM traffic for h1).
    h1_bf = h1.astype(jnp.bfloat16)
    h1_ref[...] = h1_bf

    # Partial BatchNorm batch statistics, pivoted by b1 (removes the bias
    # mean so E[c^2] - E[c]^2 does not cancel catastrophically).  Computed
    # from the bf16-rounded values stage 2 will re-read.
    c = h1_bf.astype(jnp.float32) - b1_ref[...]
    if n_pad != n_real:                                     # mask padded rows
        row = (jax.lax.broadcasted_iota(jnp.int32, (tm, 1), 0)
               + pl.program_id(1) * tm)
        c = jnp.where(row < n_real, c, 0.0)
    ssum_ref[...] = jnp.sum(c, axis=0).reshape(1, 1, -1)
    ssq_ref[...] = jnp.sum(c * c, axis=0).reshape(1, 1, -1)


# --------------------------------------------------------------------------
# Stage 2: BatchNorm (precomputed scale/shift) + ReLU + Linear2 + residual.
# --------------------------------------------------------------------------
def _stage2_kernel(h1_ref, x_ref, bn_scale_ref, bn_shift_ref, w2_ref, b2_ref,
                   o_ref):
    h = h1_ref[...].astype(jnp.float32) * bn_scale_ref[...] + bn_shift_ref[...]
    h = jnp.maximum(h, 0.0)
    # Dropout: identity (eval mode).
    y = jnp.dot(h.astype(jnp.bfloat16), w2_ref[...],
                preferred_element_type=jnp.float32) + b2_ref[...]
    o_ref[...] = (y + x_ref[...].astype(jnp.float32)).astype(o_ref.dtype)


# --------------------------------------------------------------------------
# Wrapper
# --------------------------------------------------------------------------
def _forward_impl(x, params, *, single_buffer):
    N, D = x.shape
    f32 = jnp.float32
    x_bytes = jnp.dtype(x.dtype).itemsize

    # Feature padding: lane-dense, 256-aligned once D isn't tiny (MXU width).
    d_pad = _round_up(D, 256) if D >= 512 else _round_up(D, 128)

    # Size-conditional output-feature tiling: keep the weight block under
    # ~1/3 of the per-core VMEM planning budget (matters on v7x at large D).
    if d_pad * d_pad * 2 > _VMEM_PLAN // 3:
        tn = 512 if d_pad % 512 == 0 else (256 if d_pad % 256 == 0 else 128)
    else:
        tn = d_pad
    grid_j = d_pad // tn

    # Batch tile: ragged-friendly, multiple of 16, shrunk to fit VMEM.
    tm = _pick_tm(N)
    while _vmem_estimate(tm, d_pad, tn, grid_j, x_bytes) > _VMEM_PLAN and tm > 16:
        tm //= 2
    n_pad = _round_up(N, tm)
    grid_n = n_pad // tm
    grid = (grid_j, grid_n)

    # Pad only when needed (host-side pad/slice are full extra HBM passes).
    xp = _maybe_pad(x, ((0, n_pad - N), (0, d_pad - D)))

    def row(p):
        return _maybe_pad(p.reshape(1, -1).astype(f32),
                          ((0, 0), (0, d_pad - D)))

    ln_g, ln_b = row(params["ln_g"]), row(params["ln_b"])
    bn_g, bn_b = row(params["bn_g"]), row(params["bn_b"])
    b1, b2 = row(params["b1"]), row(params["b2"])
    w1 = _maybe_pad(params["w1"].astype(jnp.bfloat16),
                    ((0, d_pad - D), (0, d_pad - D)))
    w2 = _maybe_pad(params["w2"].astype(jnp.bfloat16),
                    ((0, d_pad - D), (0, d_pad - D)))

    # ---- BlockSpecs -----------------------------------------------------
    def const_spec(shape):
        idx = lambda j, i: (0,) * len(shape)
        if single_buffer:
            # Constant index_map -> never re-fetched; single-buffer it to
            # save VMEM (big win for the resident weight on v7x).
            return pl.BlockSpec(shape, idx, pipeline_mode=pl.Buffered(1))
        return pl.BlockSpec(shape, idx)

    x_full_spec = pl.BlockSpec((tm, d_pad), lambda j, i: (i, 0))
    h1_out_spec = pl.BlockSpec((tm, tn), lambda j, i: (i, j))
    stat_spec = pl.BlockSpec((1, 1, tn), lambda j, i: (i, 0, j))
    res_spec = pl.BlockSpec((tm, tn), lambda j, i: (i, j))
    out_spec = pl.BlockSpec((tm, tn), lambda j, i: (i, j))
    if grid_j == 1:
        w_spec = const_spec((d_pad, d_pad))
        bvec_spec = const_spec((1, d_pad))
    else:
        w_spec = pl.BlockSpec((d_pad, tn), lambda j, i: (0, j))
        bvec_spec = pl.BlockSpec((1, tn), lambda j, i: (0, j))

    # ---- Compiler params: megacore + per-TC VMEM budget -----------------
    vmem_est = _vmem_estimate(tm, d_pad, tn, grid_j, x_bytes)
    vmem_limit = int(min(max(vmem_est * 5 // 4 + (4 << 20), 16 << 20),
                         _VMEM_CAP))
    cparams = pltpu.CompilerParams(
        dimension_semantics=("parallel", "parallel"),
        vmem_limit_bytes=vmem_limit)

    # ---- Stage 1 ---------------------------------------------------------
    stage1 = functools.partial(_stage1_kernel, d_real=D, tm=tm,
                               n_real=N, n_pad=n_pad)
    h1, ssum, ssq = pl.pallas_call(
        stage1,
        grid=grid,
        out_shape=(jax.ShapeDtypeStruct((n_pad, d_pad), jnp.bfloat16),
                   jax.ShapeDtypeStruct((grid_n, 1, d_pad), f32),
                   jax.ShapeDtypeStruct((grid_n, 1, d_pad), f32)),
        in_specs=[x_full_spec, const_spec((1, d_pad)), const_spec((1, d_pad)),
                  w_spec, bvec_spec],
        out_specs=(h1_out_spec, stat_spec, stat_spec),
        compiler_params=cparams,
    )(xp, ln_g, ln_b, w1, b1)

    # ---- Fold partials into BatchNorm scale / shift (tiny, plain JAX) ---
    total = jnp.sum(ssum, axis=0)                     # (1, d_pad), b1-pivoted
    total_sq = jnp.sum(ssq, axis=0)
    mean_c = total / N
    bvar = jnp.maximum(total_sq / N - mean_c * mean_c, 0.0)   # biased variance
    bmean = mean_c + b1
    inv_std = jax.lax.rsqrt(bvar + 1e-5)
    bn_scale = bn_g * inv_std
    bn_shift = bn_b - bmean * bn_scale

    # ---- Stage 2 ---------------------------------------------------------
    h1_in_spec = pl.BlockSpec((tm, d_pad), lambda j, i: (i, 0))
    out = pl.pallas_call(
        _stage2_kernel,
        grid=grid,
        out_shape=jax.ShapeDtypeStruct((n_pad, d_pad), x.dtype),
        in_specs=[h1_in_spec, res_spec, const_spec((1, d_pad)),
                  const_spec((1, d_pad)), w_spec, bvec_spec],
        out_specs=out_spec,
        compiler_params=cparams,
    )(h1, xp, bn_scale, bn_shift, w2, b2)

    if n_pad != N or d_pad != D:
        out = out[:N, :D]
    return out


def block_forward(x, params):
    """x: (N, D).  params: dict of weights (see init_params)."""
    try:
        return _forward_impl(x, params, single_buffer=True)
    except Exception:
        # Fallback if pipeline_mode=pl.Buffered(1) is unsupported in this
        # runtime; identical math with default (double) buffering.
        return _forward_impl(x, params, single_buffer=False)


# --------------------------------------------------------------------------
# Parameters + pure-JAX reference (for a sanity check)
# --------------------------------------------------------------------------
def init_params(key, hidden_dim):
    """Deterministic synthetic parameters matching the module's shapes."""
    ks = jax.random.split(key, 4)
    bound = 1.0 / jnp.sqrt(hidden_dim)
    return {
        "ln_g": jnp.ones((hidden_dim,), jnp.float32),
        "ln_b": jnp.zeros((hidden_dim,), jnp.float32),
        "w1": jax.random.uniform(ks[0], (hidden_dim, hidden_dim),
                                 jnp.float32, -bound, bound),   # (in, out)
        "b1": jax.random.uniform(ks[1], (hidden_dim,),
                                 jnp.float32, -bound, bound),
        "bn_g": jnp.ones((hidden_dim,), jnp.float32),
        "bn_b": jnp.zeros((hidden_dim,), jnp.float32),
        "w2": jax.random.uniform(ks[2], (hidden_dim, hidden_dim),
                                 jnp.float32, -bound, bound),   # (in, out)
        "b2": jax.random.uniform(ks[3], (hidden_dim,),
                                 jnp.float32, -bound, bound),
    }


def block_reference(x, params):
    h = x.astype(jnp.float32)
    mu = jnp.mean(h, axis=-1, keepdims=True)
    var = jnp.mean((h - mu) ** 2, axis=-1, keepdims=True)
    h = (h - mu) * jax.lax.rsqrt(var + 1e-5)
    h = h * params["ln_g"] + params["ln_b"]
    h = h @ params["w1"] + params["b1"]
    bmu = jnp.mean(h, axis=0, keepdims=True)
    bvar = jnp.mean((h - bmu) ** 2, axis=0, keepdims=True)
    h = (h - bmu) * jax.lax.rsqrt(bvar + 1e-5)
    h = h * params["bn_g"] + params["bn_b"]
    h = jnp.maximum(h, 0.0)
    h = h @ params["w2"] + params["b2"]
    return h + x


if __name__ == "__main__":
    key = jax.random.PRNGKey(0)
    k_x, k_p = jax.random.split(key)

    batch, hidden_dim = 8, 32
    x = jax.random.normal(k_x, (batch, hidden_dim), jnp.float32)
    params = init_params(k_p, hidden_dim)

    out = block_forward(x, params)
    out = jax.block_until_ready(out)

    assert out.shape == (batch, hidden_dim)
    assert out.dtype == x.dtype
    assert bool(jnp.all(jnp.isfinite(out)))

    # Loose tolerance: kernel uses bf16 MXU inputs / bf16 h1 storage with
    # f32 accumulation and f32 normalization statistics.
    ref = block_reference(x, params)
    max_err = float(jnp.max(jnp.abs(out - ref)))
    assert max_err < 1e-1, f"max abs err {max_err}"

    print("KERNEL_OK")
</pallas_src>

<mosaic_0001>
module attributes {stable_mosaic.version = 11 : i64} {
  func.func @_stage1_kernel(%arg0: i32, %arg1: i32, %arg2: memref<16x128xf32, #tpu.memory_space<vmem>>, %arg3: memref<1x128xf32, #tpu.memory_space<vmem>>, %arg4: memref<1x128xf32, #tpu.memory_space<vmem>>, %arg5: memref<128x128xbf16, #tpu.memory_space<vmem>>, %arg6: memref<1x128xf32, #tpu.memory_space<vmem>>, %arg7: memref<16x128xbf16, #tpu.memory_space<vmem>>, %arg8: memref<1x1x128xf32, #tpu.memory_space<vmem>>, %arg9: memref<1x1x128xf32, #tpu.memory_space<vmem>>) attributes {dimension_semantics = [#tpu.dimension_semantics<parallel>, #tpu.dimension_semantics<parallel>], iteration_bounds = array<i64: 1, 1>, scalar_prefetch = 0 : i64, scratch_operands = 0 : i64, tpu.core_type = #tpu.core_type<tc>, window_params = [{transform_indices = @transform_0, window_bounds = array<i64: 16, 128>}, {pipeline_mode = #tpu.pipeline_mode<synchronous>, transform_indices = @transform_1, window_bounds = array<i64: 1, 128>}, {pipeline_mode = #tpu.pipeline_mode<synchronous>, transform_indices = @transform_2, window_bounds = array<i64: 1, 128>}, {pipeline_mode = #tpu.pipeline_mode<synchronous>, transform_indices = @transform_3, window_bounds = array<i64: 128, 128>}, {pipeline_mode = #tpu.pipeline_mode<synchronous>, transform_indices = @transform_4, window_bounds = array<i64: 1, 128>}, {transform_indices = @transform_5, window_bounds = array<i64: 16, 128>}, {transform_indices = @transform_6, window_bounds = array<i64: 1, 1, 128>}, {transform_indices = @transform_7, window_bounds = array<i64: 1, 1, 128>}]} {
    %c0 = arith.constant 0 : index
    %c0_0 = arith.constant 0 : index
    %0 = vector.load %arg2[%c0, %c0_0] : memref<16x128xf32, #tpu.memory_space<vmem>>, vector<16x128xf32>
    %cst = arith.constant dense<0.000000e+00> : vector<16xf32>
    %1 = vector.multi_reduction <add>, %0, %cst [1] : vector<16x128xf32> to vector<16xf32>
    %2 = vector.shape_cast %1 : vector<16xf32> to vector<16x1xf32>
    %3 = arith.mulf %0, %0 : vector<16x128xf32>
    %cst_1 = arith.constant dense<0.000000e+00> : vector<16xf32>
    %4 = vector.multi_reduction <add>, %3, %cst_1 [1] : vector<16x128xf32> to vector<16xf32>
    %5 = vector.shape_cast %4 : vector<16xf32> to vector<16x1xf32>
    %cst_2 = arith.constant 3.125000e-02 : f32
    %6 = vector.broadcast %cst_2 : f32 to vector<16x1xf32>
    %7 = arith.mulf %2, %6 : vector<16x1xf32>
    %cst_3 = arith.constant 3.125000e-02 : f32
    %8 = vector.broadcast %cst_3 : f32 to vector<16x1xf32>
    %9 = arith.mulf %5, %8 : vector<16x1xf32>
    %10 = arith.mulf %7, %7 : vector<16x1xf32>
    %11 = arith.subf %9, %10 : vector<16x1xf32>
    %cst_4 = arith.constant 0.000000e+00 : f32
    %12 = vector.broadcast %cst_4 : f32 to vector<16x1xf32>
    %13 = arith.maximumf %11, %12 : vector<16x1xf32>
    %14 = vector.broadcast %7 : vector<16x1xf32> to vector<16x128xf32>
    %15 = arith.subf %0, %14 : vector<16x128xf32>
    %cst_5 = arith.constant 9.99999974E-6 : f32
    %16 = vector.broadcast %cst_5 : f32 to vector<16x1xf32>
    %17 = arith.addf %13, %16 : vector<16x1xf32>
    %18 = math.rsqrt %17 : vector<16x1xf32>
    %19 = vector.broadcast %18 : vector<16x1xf32> to vector<16x128xf32>
    %20 = arith.mulf %15, %19 : vector<16x128xf32>
    %c0_6 = arith.constant 0 : index
    %c0_7 = arith.constant 0 : index
    %21 = vector.load %arg3[%c0_6, %c0_7] : memref<1x128xf32, #tpu.memory_space<vmem>>, vector<1x128xf32>
    %22 = vector.broadcast %21 : vector<1x128xf32> to vector<16x128xf32>
    %23 = arith.mulf %20, %22 : vector<16x128xf32>
    %c0_8 = arith.constant 0 : index
    %c0_9 = arith.constant 0 : index
    %24 = vector.load %arg4[%c0_8, %c0_9] : memref<1x128xf32, #tpu.memory_space<vmem>>, vector<1x128xf32>
    %25 = vector.broadcast %24 : vector<1x128xf32> to vector<16x128xf32>
    %26 = arith.addf %23, %25 : vector<16x128xf32>
    %27 = arith.truncf %26 : vector<16x128xf32> to vector<16x128xbf16>
    %c0_10 = arith.constant 0 : index
    %c0_11 = arith.constant 0 : index
    %28 = vector.load %arg5[%c0_10, %c0_11] : memref<128x128xbf16, #tpu.memory_space<vmem>>, vector<128x128xbf16>
    %cst_12 = arith.constant dense<0.000000e+00> : vector<16x128xf32>
    %29 = tpu.matmul %27, %28, %cst_12 {dimension_numbers = #tpu.dot_dimension_numbers<[1], [0], [0], [1], [0, 0, 1, 1], [], []>} : vector<16x128xbf16>, vector<128x128xbf16>, vector<16x128xf32> -> vector<16x128xf32>
    %c0_13 = arith.constant 0 : index
    %c0_14 = arith.constant 0 : index
    %30 = vector.load %arg6[%c0_13, %c0_14] : memref<1x128xf32, #tpu.memory_space<vmem>>, vector<1x128xf32>
    %31 = vector.broadcast %30 : vector<1x128xf32> to vector<16x128xf32>
    %32 = arith.addf %29, %31 : vector<16x128xf32>
    %33 = arith.truncf %32 : vector<16x128xf32> to vector<16x128xbf16>
    %c0_15 = arith.constant 0 : index
    %c0_16 = arith.constant 0 : index
    %34 = vector.load %arg7[%c0_15, %c0_16] : memref<16x128xbf16, #tpu.memory_space<vmem>>, vector<16x128xbf16>
    tpu.vector_store %arg7[%c0_15, %c0_16], %33 {strides = array<i32>} : memref<16x128xbf16, #tpu.memory_space<vmem>>, vector<16x128xbf16>,
    %35 = arith.extf %33 : vector<16x128xbf16> to vector<16x128xf32>
    %c0_17 = arith.constant 0 : index
    %c0_18 = arith.constant 0 : index
    %36 = vector.load %arg6[%c0_17, %c0_18] : memref<1x128xf32, #tpu.memory_space<vmem>>, vector<1x128xf32>
    %37 = vector.broadcast %36 : vector<1x128xf32> to vector<16x128xf32>
    %38 = arith.subf %35, %37 : vector<16x128xf32>
    %39 = tpu.iota {dimensions = array<i32: 0>} : vector<16x1xi32>
    %c16_i32 = arith.constant 16 : i32
    %40 = arith.muli %arg1, %c16_i32 : i32
    %41 = vector.broadcast %40 : i32 to vector<16x1xi32>
    %42 = arith.addi %39, %41 : vector<16x1xi32>
    %c8_i32 = arith.constant 8 : i32
    %43 = vector.broadcast %c8_i32 : i32 to vector<16x1xi32>
    %44 = arith.cmpi slt, %42, %43 : vector<16x1xi32>
    %cst_19 = arith.constant 0.000000e+00 : f32
    %45 = vector.shape_cast %44 : vector<16x1xi1> to vector<16x1xi1>
    %46 = vector.broadcast %45 : vector<16x1xi1> to vector<16x128xi1>
    %47 = vector.broadcast %cst_19 : f32 to vector<16x128xf32>
    %48 = arith.select %46, %38, %47 : vector<16x128xi1>, vector<16x128xf32>
    %cst_20 = arith.constant dense<0.000000e+00> : vector<128xf32>
    %49 = vector.multi_reduction <add>, %48, %cst_20 [0] : vector<16x128xf32> to vector<128xf32>
    %50 = vector.shape_cast %49 : vector<128xf32> to vector<1x1x128xf32>
    %c0_21 = arith.constant 0 : index
    %c0_22 = arith.constant 0 : index
    %c0_23 = arith.constant 0 : index
    %51 = vector.load %arg8[%c0_21, %c0_22, %c0_23] : memref<1x1x128xf32, #tpu.memory_space<vmem>>, vector<1x1x128xf32>
    tpu.vector_store %arg8[%c0_21, %c0_22, %c0_23], %50 {strides = array<i32>} : memref<1x1x128xf32, #tpu.memory_space<vmem>>, vector<1x1x128xf32>,
    %52 = arith.mulf %48, %48 : vector<16x128xf32>
    %cst_24 = arith.constant dense<0.000000e+00> : vector<128xf32>
    %53 = vector.multi_reduction <add>, %52, %cst_24 [0] : vector<16x128xf32> to vector<128xf32>
    %54 = vector.shape_cast %53 : vector<128xf32> to vector<1x1x128xf32>
    %c0_25 = arith.constant 0 : index
    %c0_26 = arith.constant 0 : index
    %c0_27 = arith.constant 0 : index
    %55 = vector.load %arg9[%c0_25, %c0_26, %c0_27] : memref<1x1x128xf32, #tpu.memory_space<vmem>>, vector<1x1x128xf32>
    tpu.vector_store %arg9[%c0_25, %c0_26, %c0_27], %54 {strides = array<i32>} : memref<1x1x128xf32, #tpu.memory_space<vmem>>, vector<1x1x128xf32>,
    return
  }
  func.func @transform_0(%arg0: i32, %arg1: i32) -> (i32, i32) {
    %c0_i32 = arith.constant 0 : i32
    %c0_i32_0 = arith.constant 0 : i32
    return %arg1, %c0_i32 : i32, i32
  }
  func.func @transform_1(%arg0: i32, %arg1: i32) -> (i32, i32) {
    %c0_i32 = arith.constant 0 : i32
    %c0_i32_0 = arith.constant 0 : i32
    %c0_i32_1 = arith.constant 0 : i32
    return %c0_i32, %c0_i32_0 : i32, i32
  }
  func.func @transform_2(%arg0: i32, %arg1: i32) -> (i32, i32) {
    %c0_i32 = arith.constant 0 : i32
    %c0_i32_0 = arith.constant 0 : i32
    %c0_i32_1 = arith.constant 0 : i32
    return %c0_i32, %c0_i32_0 : i32, i32
  }
  func.func @transform_3(%arg0: i32, %arg1: i32) -> (i32, i32) {
    %c0_i32 = arith.constant 0 : i32
    %c0_i32_0 = arith.constant 0 : i32
    %c0_i32_1 = arith.constant 0 : i32
    return %c0_i32, %c0_i32_0 : i32, i32
  }
  func.func @transform_4(%arg0: i32, %arg1: i32) -> (i32, i32) {
    %c0_i32 = arith.constant 0 : i32
    %c0_i32_0 = arith.constant 0 : i32
    %c0_i32_1 = arith.constant 0 : i32
    return %c0_i32, %c0_i32_0 : i32, i32
  }
  func.func @transform_5(%arg0: i32, %arg1: i32) -> (i32, i32) {
    %c0_i32 = arith.constant 0 : i32
    return %arg1, %arg0 : i32, i32
  }
  func.func @transform_6(%arg0: i32, %arg1: i32) -> (i32, i32, i32) {
    %c0_i32 = arith.constant 0 : i32
    %c0_i32_0 = arith.constant 0 : i32
    return %arg1, %c0_i32, %arg0 : i32, i32, i32
  }
  func.func @transform_7(%arg0: i32, %arg1: i32) -> (i32, i32, i32) {
    %c0_i32 = arith.constant 0 : i32
    %c0_i32_0 = arith.constant 0 : i32
    return %arg1, %c0_i32, %arg0 : i32, i32, i32
  }
}

module attributes {stable_mosaic.version = 11 : i64} {
  func.func @_stage1_kernel(%arg0: i32, %arg1: i32, %arg2: memref<16x128xf32, #tpu.memory_space<vmem>>, %arg3: memref<1x128xf32, #tpu.memory_space<vmem>>, %arg4: memref<1x128xf32, #tpu.memory_space<vmem>>, %arg5: memref<128x128xbf16, #tpu.memory_space<vmem>>, %arg6: memref<1x128xf32, #tpu.memory_space<vmem>>, %arg7: memref<16x128xbf16, #tpu.memory_space<vmem>>, %arg8: memref<1x1x128xf32, #tpu.memory_space<vmem>>, %arg9: memref<1x1x128xf32, #tpu.memory_space<vmem>>) attributes {dimension_semantics = [#tpu.dimension_semantics<parallel>, #tpu.dimension_semantics<parallel>], iteration_bounds = array<i64: 1, 1>, scalar_prefetch = 0 : i64, scratch_operands = 0 : i64, tpu.core_type = #tpu.core_type<tc>, window_params = [{transform_indices = @transform_0, window_bounds = array<i64: 16, 128>}, {pipeline_mode = #tpu.pipeline_mode<synchronous>, transform_indices = @transform_1, window_bounds = array<i64: 1, 128>}, {pipeline_mode = #tpu.pipeline_mode<synchronous>, transform_indices = @transform_2, window_bounds = array<i64: 1, 128>}, {pipeline_mode = #tpu.pipeline_mode<synchronous>, transform_indices = @transform_3, window_bounds = array<i64: 128, 128>}, {pipeline_mode = #tpu.pipeline_mode<synchronous>, transform_indices = @transform_4, window_bounds = array<i64: 1, 128>}, {transform_indices = @transform_5, window_bounds = array<i64: 16, 128>}, {transform_indices = @transform_6, window_bounds = array<i64: 1, 1, 128>}, {transform_indices = @transform_7, window_bounds = array<i64: 1, 1, 128>}]} {
    %c0 = arith.constant 0 : index
    %c0_0 = arith.constant 0 : index
    %0 = vector.load %arg2[%c0, %c0_0] : memref<16x128xf32, #tpu.memory_space<vmem>>, vector<16x128xf32>
    %cst = arith.constant dense<0.000000e+00> : vector<16xf32>
    %1 = vector.multi_reduction <add>, %0, %cst [1] : vector<16x128xf32> to vector<16xf32>
    %2 = vector.shape_cast %1 : vector<16xf32> to vector<16x1xf32>
    %3 = arith.mulf %0, %0 : vector<16x128xf32>
    %cst_1 = arith.constant dense<0.000000e+00> : vector<16xf32>
    %4 = vector.multi_reduction <add>, %3, %cst_1 [1] : vector<16x128xf32> to vector<16xf32>
    %5 = vector.shape_cast %4 : vector<16xf32> to vector<16x1xf32>
    %cst_2 = arith.constant 3.125000e-02 : f32
    %6 = vector.broadcast %cst_2 : f32 to vector<16x1xf32>
    %7 = arith.mulf %2, %6 : vector<16x1xf32>
    %cst_3 = arith.constant 3.125000e-02 : f32
    %8 = vector.broadcast %cst_3 : f32 to vector<16x1xf32>
    %9 = arith.mulf %5, %8 : vector<16x1xf32>
    %10 = arith.mulf %7, %7 : vector<16x1xf32>
    %11 = arith.subf %9, %10 : vector<16x1xf32>
    %cst_4 = arith.constant 0.000000e+00 : f32
    %12 = vector.broadcast %cst_4 : f32 to vector<16x1xf32>
    %13 = arith.maximumf %11, %12 : vector<16x1xf32>
    %14 = vector.broadcast %7 : vector<16x1xf32> to vector<16x128xf32>
    %15 = arith.subf %0, %14 : vector<16x128xf32>
    %cst_5 = arith.constant 9.99999974E-6 : f32
    %16 = vector.broadcast %cst_5 : f32 to vector<16x1xf32>
    %17 = arith.addf %13, %16 : vector<16x1xf32>
    %18 = math.rsqrt %17 : vector<16x1xf32>
    %19 = vector.broadcast %18 : vector<16x1xf32> to vector<16x128xf32>
    %20 = arith.mulf %15, %19 : vector<16x128xf32>
    %c0_6 = arith.constant 0 : index
    %c0_7 = arith.constant 0 : index
    %21 = vector.load %arg3[%c0_6, %c0_7] : memref<1x128xf32, #tpu.memory_space<vmem>>, vector<1x128xf32>
    %22 = vector.broadcast %21 : vector<1x128xf32> to vector<16x128xf32>
    %23 = arith.mulf %20, %22 : vector<16x128xf32>
    %c0_8 = arith.constant 0 : index
    %c0_9 = arith.constant 0 : index
    %24 = vector.load %arg4[%c0_8, %c0_9] : memref<1x128xf32, #tpu.memory_space<vmem>>, vector<1x128xf32>
    %25 = vector.broadcast %24 : vector<1x128xf32> to vector<16x128xf32>
    %26 = arith.addf %23, %25 : vector<16x128xf32>
    %27 = arith.truncf %26 : vector<16x128xf32> to vector<16x128xbf16>
    %c0_10 = arith.constant 0 : index
    %c0_11 = arith.constant 0 : index
    %28 = vector.load %arg5[%c0_10, %c0_11] : memref<128x128xbf16, #tpu.memory_space<vmem>>, vector<128x128xbf16>
    %cst_12 = arith.constant dense<0.000000e+00> : vector<16x128xf32>
    %29 = tpu.matmul %27, %28, %cst_12 {dimension_numbers = #tpu.dot_dimension_numbers<[1], [0], [0], [1], [0, 0, 1, 1], [], []>} : vector<16x128xbf16>, vector<128x128xbf16>, vector<16x128xf32> -> vector<16x128xf32>
    %c0_13 = arith.constant 0 : index
    %c0_14 = arith.constant 0 : index
    %30 = vector.load %arg6[%c0_13, %c0_14] : memref<1x128xf32, #tpu.memory_space<vmem>>, vector<1x128xf32>
    %31 = vector.broadcast %30 : vector<1x128xf32> to vector<16x128xf32>
    %32 = arith.addf %29, %31 : vector<16x128xf32>
    %33 = arith.truncf %32 : vector<16x128xf32> to vector<16x128xbf16>
    %c0_15 = arith.constant 0 : index
    %c0_16 = arith.constant 0 : index
    %34 = vector.load %arg7[%c0_15, %c0_16] : memref<16x128xbf16, #tpu.memory_space<vmem>>, vector<16x128xbf16>
    tpu.vector_store %arg7[%c0_15, %c0_16], %33 {strides = array<i32>} : memref<16x128xbf16, #tpu.memory_space<vmem>>, vector<16x128xbf16>,
    %35 = arith.extf %33 : vector<16x128xbf16> to vector<16x128xf32>
    %c0_17 = arith.constant 0 : index
    %c0_18 = arith.constant 0 : index
    %36 = vector.load %arg6[%c0_17, %c0_18] : memref<1x128xf32, #tpu.memory_space<vmem>>, vector<1x128xf32>
    %37 = vector.broadcast %36 : vector<1x128xf32> to vector<16x128xf32>
    %38 = arith.subf %35, %37 : vector<16x128xf32>
    %39 = tpu.iota {dimensions = array<i32: 0>} : vector<16x1xi32>
    %c16_i32 = arith.constant 16 : i32
    %40 = arith.muli %arg1, %c16_i32 : i32
    %41 = vector.broadcast %40 : i32 to vector<16x1xi32>
    %42 = arith.addi %39, %41 : vector<16x1xi32>
    %c8_i32 = arith.constant 8 : i32
    %43 = vector.broadcast %c8_i32 : i32 to vector<16x1xi32>
    %44 = arith.cmpi slt, %42, %43 : vector<16x1xi32>
    %cst_19 = arith.constant 0.000000e+00 : f32
    %45 = vector.shape_cast %44 : vector<16x1xi1> to vector<16x1xi1>
    %46 = vector.broadcast %45 : vector<16x1xi1> to vector<16x128xi1>
    %47 = vector.broadcast %cst_19 : f32 to vector<16x128xf32>
    %48 = arith.select %46, %38, %47 : vector<16x128xi1>, vector<16x128xf32>
    %cst_20 = arith.constant dense<0.000000e+00> : vector<128xf32>
    %49 = vector.multi_reduction <add>, %48, %cst_20 [0] : vector<16x128xf32> to vector<128xf32>
    %50 = vector.shape_cast %49 : vector<128xf32> to vector<1x1x128xf32>
    %c0_21 = arith.constant 0 : index
    %c0_22 = arith.constant 0 : index
    %c0_23 = arith.constant 0 : index
    %51 = vector.load %arg8[%c0_21, %c0_22, %c0_23] : memref<1x1x128xf32, #tpu.memory_space<vmem>>, vector<1x1x128xf32>
    tpu.vector_store %arg8[%c0_21, %c0_22, %c0_23], %50 {strides = array<i32>} : memref<1x1x128xf32, #tpu.memory_space<vmem>>, vector<1x1x128xf32>,
    %52 = arith.mulf %48, %48 : vector<16x128xf32>
    %cst_24 = arith.constant dense<0.000000e+00> : vector<128xf32>
    %53 = vector.multi_reduction <add>, %52, %cst_24 [0] : vector<16x128xf32> to vector<128xf32>
    %54 = vector.shape_cast %53 : vector<128xf32> to vector<1x1x128xf32>
    %c0_25 = arith.constant 0 : index
    %c0_26 = arith.constant 0 : index
    %c0_27 = arith.constant 0 : index
    %55 = vector.load %arg9[%c0_25, %c0_26, %c0_27] : memref<1x1x128xf32, #tpu.memory_space<vmem>>, vector<1x1x128xf32>
    tpu.vector_store %arg9[%c0_25, %c0_26, %c0_27], %54 {strides = array<i32>} : memref<1x1x128xf32, #tpu.memory_space<vmem>>, vector<1x1x128xf32>,
    return
  }
  func.func @transform_0(%arg0: i32, %arg1: i32) -> (i32, i32) {
    %c0_i32 = arith.constant 0 : i32
    %c0_i32_0 = arith.constant 0 : i32
    return %arg1, %c0_i32 : i32, i32
  }
  func.func @transform_1(%arg0: i32, %arg1: i32) -> (i32, i32) {
    %c0_i32 = arith.constant 0 : i32
    %c0_i32_0 = arith.constant 0 : i32
    %c0_i32_1 = arith.constant 0 : i32
    return %c0_i32, %c0_i32_0 : i32, i32
  }
  func.func @transform_2(%arg0: i32, %arg1: i32) -> (i32, i32) {
    %c0_i32 = arith.constant 0 : i32
    %c0_i32_0 = arith.constant 0 : i32
    %c0_i32_1 = arith.constant 0 : i32
    return %c0_i32, %c0_i32_0 : i32, i32
  }
  func.func @transform_3(%arg0: i32, %arg1: i32) -> (i32, i32) {
    %c0_i32 = arith.constant 0 : i32
    %c0_i32_0 = arith.constant 0 : i32
    %c0_i32_1 = arith.constant 0 : i32
    return %c0_i32, %c0_i32_0 : i32, i32
  }
  func.func @transform_4(%arg0: i32, %arg1: i32) -> (i32, i32) {
    %c0_i32 = arith.constant 0 : i32
    %c0_i32_0 = arith.constant 0 : i32
    %c0_i32_1 = arith.constant 0 : i32
    return %c0_i32, %c0_i32_0 : i32, i32
  }
  func.func @transform_5(%arg0: i32, %arg1: i32) -> (i32, i32) {
    %c0_i32 = arith.constant 0 : i32
    return %arg1, %arg0 : i32, i32
  }
  func.func @transform_6(%arg0: i32, %arg1: i32) -> (i32, i32, i32) {
    %c0_i32 = arith.constant 0 : i32
    %c0_i32_0 = arith.constant 0 : i32
    return %arg1, %c0_i32, %arg0 : i32, i32, i32
  }
  func.func @transform_7(%arg0: i32, %arg1: i32) -> (i32, i32, i32) {
    %c0_i32 = arith.constant 0 : i32
    %c0_i32_0 = arith.constant 0 : i32
    return %arg1, %c0_i32, %arg0 : i32, i32, i32
  }
}

</mosaic_0001>

<bundles_post_ra>
// kernel: tpu_custom_call.1
= control target key start
LH: loop header
LB: loop body
LE: loop exit
PB: predicated region body
PF: predicated region fallthrough
CT: control target
= control target key end

     0   :  { %13 = vsyncpa [#allocation3], 0  ;;  %s639_s0 = inlined_call_operand.hbm [shape: f32[16,128], index: 0, kind: input, shape index: {}]   ;;  %s640_s1 = inlined_call_operand.vmem [shape: f32[1,128], index: 1, kind: input, shape index: {}]   ;;  %s641_s2 = inlined_call_operand.vmem [shape: f32[1,128], index: 2, kind: input, shape index: {}]   ;;  %s642_s3 = inlined_call_operand.hbm [shape: bf16[128,128], index: 3, kind: input, shape index: {}]   ;;  %s643_s4 = inlined_call_operand.vmem [shape: f32[1,128], index: 4, kind: input, shape index: {}]   ;;  %s644_s5 = inlined_call_operand.hbm [shape: bf16[16,128], index: 5, kind: output, shape index: {0}]   ;;  %s645_s6 = inlined_call_operand.hbm [shape: f32[1,1,128], index: 6, kind: output, shape index: {1}]   ;;  %s646_s7 = inlined_call_operand.hbm [shape: f32[1,1,128], index: 7, kind: output, shape index: {2}]  }
   0x1   :  { %14 = vsyncpa [#allocation6], 0 }
   0x2   :  { %15 = vsyncpa [#allocation4], 0 }
   0x3   :  { %16 = vsyncpa [#allocation9], 0  ;;  %s505_s24 = smov [#allocation2]   ;;  %s387_s28 = scalar_lea.hbm %s639_s0, 256 }
   0x4   :  { %s22_s25 = sshll.u32 %s505_s24, 4  ;;  %p388_p0 = scmp.ne.s32.totalorder %s639_s0, %s387_s28  ;;  %s23_s25 = int_to_ptr.vmem [resolvable:$true] %s22_s25 }
   0x5   :  { %p391_p1 = scmp.lt.u32.totalorder %s387_s28, %s639_s0 }
   0x7   :  { %p393_p2 = pnand %p391_p1, %p388_p0 }
   0x9   :  { %396 = shalt.err (!%p393_p2)
}
   0xa   :  { %s397_s10 = scalar_lea.vmem %s23_s25, 256  ;;  %p402_p4 = scmp.lt.s32.totalorder %s23_s25, %s23_s25 }
   0xb   :  { %p398_p3 = scmp.ne.s32.totalorder %s23_s25, %s397_s10  ;;  %p403_p5 = scmp.lt.s32.totalorder %s397_s10, %s397_s10 }
   0xd   :  { %p404_p6 = por %p403_p5, %p402_p4 }
   0xf   :  { %p405_p7 = pnand %p404_p6, %p398_p3 }
  0x11   :  { %408 = shalt.err (!%p405_p7)
}
  0x12   :  { %s506_s11 = smov 128   ;;  %s507_s12 = smov 8  }
  0x13   :  { %28 = dma.hbm_to_vmem [thread:$0]  %s639_s0, 256, %s23_s25, [#allocation3], %s506_s11, %s506_s11, %s507_s12  }
  0x14   :  { %s508_s15 = smov [#allocation5]   ;;  %s409_s19 = scalar_lea.hbm %s642_s3, 1024 }
  0x15   :  { %s38_s16 = sshll.u32 %s508_s15, 4  ;;  %p410_p8 = scmp.ne.s32.totalorder %s642_s3, %s409_s19  ;;  %s39_s16 = int_to_ptr.vmem [resolvable:$true] %s38_s16 }
  0x16   :  { %p413_p9 = scmp.lt.u32.totalorder %s409_s19, %s642_s3 }
  0x18   :  { %p415_p10 = pnand %p413_p9, %p410_p8 }
  0x1a   :  { %418 = shalt.err (!%p415_p10)
}
  0x1b   :  { %s419_s24 = scalar_lea.vmem %s39_s16, 1024  ;;  %p424_p12 = scmp.lt.s32.totalorder %s39_s16, %s39_s16 }
  0x1c   :  { %p420_p11 = scmp.ne.s32.totalorder %s39_s16, %s419_s24  ;;  %p425_p13 = scmp.lt.s32.totalorder %s419_s24, %s419_s24 }
  0x1e   :  { %p426_p0 = por %p425_p13, %p424_p12 }
  0x20   :  { %p427_p1 = pnand %p426_p0, %p420_p11 }
  0x22   :  { %430 = shalt.err (!%p427_p1)
}
  0x23   :  { %s509_s0 = smov 64   ;;  %s510_s25 = smov 4  }
  0x24   :  { %44 = dma.hbm_to_vmem [thread:$0]  %s642_s3, 1024, %s39_s16, [#allocation6], %s509_s0, %s509_s0, %s510_s25  }
  0x25   :  { %497 = dma.done.wait [#allocation3], 256  }
  0x26   :  { %498 = vsyncadd [#allocation3], 4294967040 }
  0x27   :  { %499 = dma.done.wait [#allocation6], 1024  }
  0x28   :  { %500 = vsyncadd [#allocation6], 4294966272  ;;  %v54_v0 = vld [vmem:[#allocation2] sm:$0xff]  ;;  %v55_v1 = vld [vmem:[#allocation2 + $0x8] sm:$0xff]  ;;  %v511_v5 = vmov 0.0   ;;  %vm512_vm0 = vmmov 0  }
  0x29   :  { %56 = vadd.xlane.f32.xlu0 %v54_v0  ;;  %v60_v2 = vmul.f32 %v54_v0, %v54_v0  ;;  %v61_v3 = vmul.f32 %v55_v1, %v55_v1  ;;  %v375_v4 = vld [vmem:[#allocation5] sm:$0xff]   ;;  %344 = vmatprep.subr.bf16.mxu0 %v511_v5  ;;  %v376_v6 = vld [vmem:[#allocation5 + $0x8] sm:$0xff]   ;;  %v377_v7 = vld [vmem:[#allocation5 + $0x10] sm:$0xff]  }
  0x2a   :  { %345 = vmatpush3.bf16.msra.mxu0 %v375_v4  ;;  %v378_v8 = vld [vmem:[#allocation5 + $0x18] sm:$0xff]   ;;  %v379_v9 = vld [vmem:[#allocation5 + $0x20] sm:$0xff]   ;;  %360 = vmatprep.mubr.msk.bf16.mxu0 %vm512_vm0, %v511_v5  ;;  %v380_v10 = vld [vmem:[#allocation5 + $0x28] sm:$0xff]  }
  0x2b   :  { %62 = vadd.xlane.f32.xlu1 %v60_v2  ;;  %346 = vmatprep.subr.bf16.mxu0 %v511_v5  ;;  %v381_v11 = vld [vmem:[#allocation5 + $0x30] sm:$0xff]   ;;  %v382_v12 = vld [vmem:[#allocation5 + $0x38] sm:$0xff]  }
  0x2c   :  { %v314_v32 = vld [vmem:[%s640_s1] ss:$0 sm:$0xff]  ;;  %s513_s1 = smov [#allocation7]  }
  0x2d   :  { %58 = vadd.xlane.f32.xlu0 %v55_v1  ;;  %v315_v37 = vld [vmem:[%s641_s2] ss:$0 sm:$0xff]  ;;  %s274_s10 = sshll.u32 %s513_s1, 4  ;;  %s275_s10 = int_to_ptr.vmem [resolvable:$true] %s274_s10 }
  0x2e   :  { %347 = vmatpush3.bf16.msra.mxu0 %v376_v6  ;;  %v316_v42 = vld [vmem:[%s643_s4] ss:$0 sm:$0xff]  ;;  %s431_s2 = scalar_lea.vmem %s275_s10, 128  ;;  %p436_p3 = scmp.lt.s32.totalorder %s275_s10, %s275_s10 }
  0x2f   :  { %64 = vadd.xlane.f32.xlu1 %v61_v3  ;;  %348 = vmatprep.subr.bf16.mxu0 %v511_v5  ;;  %p432_p2 = scmp.ne.s32.totalorder %s275_s10, %s431_s2  ;;  %p437_p4 = scmp.lt.s32.totalorder %s431_s2, %s431_s2 }
  0x31   :  { %p438_p5 = por %p437_p4, %p436_p3 }
  0x32   :  { %349 = vmatpush3.bf16.msra.mxu0 %v377_v7 }
  0x33   :  { %350 = vmatprep.subr.bf16.mxu0 %v511_v5  ;;  %p439_p6 = pnand %p438_p5, %p432_p2 }
  0x36   :  { %351 = vmatpush3.bf16.msra.mxu0 %v378_v8 }
  0x37   :  { %352 = vmatprep.subr.bf16.mxu0 %v511_v5 }
  0x3a   :  { %353 = vmatpush3.bf16.msra.mxu0 %v379_v9 }
  0x3b   :  { %354 = vmatprep.subr.bf16.mxu0 %v511_v5 }
  0x3e   :  { %355 = vmatpush3.bf16.msra.mxu0 %v380_v10 }
  0x3f   :  { %356 = vmatprep.subr.bf16.mxu0 %v511_v5 }
  0x42   :  { %357 = vmatpush3.bf16.msra.mxu0 %v381_v11 }
  0x43   :  { %358 = vmatprep.subr.bf16.mxu0 %v511_v5 }
  0x46   :  { %359 = vmatpush3.bf16.msra.mxu0 %v382_v12 }
  0xb6   :  { %v57_v13 = vpop.xlane.xlu0 %56 }
  0xb7   :  { %v66_v14 = vmul.f32 0.03125, %v57_v13 }
  0xb8   :  { %v63_v15 = vpop.xlane.xlu1 %62 }
  0xb9   :  { %v70_v16 = vmul.f32 %v66_v14, %v66_v14  ;;  %v68_v17 = vmul.f32 0.03125, %v63_v15  ;;  %v76_v29 = vsub.f32 %v54_v0, %v66_v14 }
  0xba   :  { %v59_v18 = vpop.xlane.xlu0 %58 }
  0xbb   :  { %v72_v19 = vsub.f32 %v68_v17, %v70_v16  ;;  %v67_v20 = vmul.f32 0.03125, %v59_v18 }
  0xbc   :  { %v65_v21 = vpop.xlane.xlu1 %64 }
  0xbd   :  { %v74_v22 = vmax.f32 %v72_v19, 0.0  ;;  %v71_v23 = vmul.f32 %v67_v20, %v67_v20  ;;  %v69_v24 = vmul.f32 0.03125, %v65_v21  ;;  %v77_v33 = vsub.f32 %v55_v1, %v67_v20 }
  0xbf   :  { %v78_v25 = vadd.f32 1e-05, %v74_v22  ;;  %v73_v26 = vsub.f32 %v69_v24, %v71_v23 }
  0xc1   :  { %383 = vrsqrt.f32 %v78_v25  ;;  %v75_v27 = vmax.f32 %v73_v26, 0.0 }
  0xc3   :  { %v79_v28 = vadd.f32 1e-05, %v75_v27 }
  0xc5   :  { %385 = vrsqrt.f32 %v79_v28 }
  0xcb   :  { %v384_v30 = vpop.eup %383 }
  0xcc   :  { %v82_v31 = vmul.f32 %v384_v30, %v76_v29 }
  0xce   :  { %v91_v36 = vmul.f32 %v314_v32, %v82_v31 }
  0xcf   :  { %v386_v34 = vpop.eup %385 }
  0xd0   :  { %v83_v35 = vmul.f32 %v386_v34, %v77_v33  ;;  %v100_v39 = vadd.f32 %v315_v37, %v91_v36 }
  0xd2   :  { %v92_v38 = vmul.f32 %v314_v32, %v83_v35 }
  0xd4   :  { %v101_v40 = vadd.f32 %v315_v37, %v92_v38 }
  0xd6   :  { %v102_v41 = vpack.c.bf16 %v101_v40, %v100_v39 }
  0xd8   :  { %361 = vmatmul.mubr.bf16.vlgmr.msra.gmra.mrb[0].mxu0 %v102_v41 }
 0x1ab   :  { %v208_v43 = vpop.f32.mrb[0].mxu0 }
 0x1ac   :  { %v362_v44 = vpop.f32.mrb[1].mxu0  ;;  %v209_v46 = vadd.f32 %v316_v42, %v208_v43 }
 0x1ad   :  { %v211_v45 = vpop.f32.mrb[2].mxu0 }
 0x1ae   :  { %v212_v47 = vadd.f32 %v316_v42, %v211_v45  ;;  %v363_v48 = vpop.f32.mrb[3].mxu0 }
 0x1b0   :  { %v215_v49 = vpack.c.bf16 %v212_v47, %v209_v46 }
 0x1b2   :  { %v225_v50 = vunpack.c.l.bf16 %v215_v49  ;;  %334 = vst [vmem:[#allocation7] sm:$0xff] %v215_v49  }
 0x1b3   :  { %442 = shalt.err (!%p439_p6)
}
 0x1b4   :  { %s443_s12 = scalar_lea.hbm %s644_s5, 128 }
 0x1b5   :  { %p444_p7 = scmp.ne.s32.totalorder %s644_s5, %s443_s12  ;;  %p447_p8 = scmp.lt.u32.totalorder %s443_s12, %s644_s5 }
 0x1b7   :  { %p449_p9 = pnand %p447_p8, %p444_p7 }
 0x1b9   :  { %452 = shalt.err (!%p449_p9)
}
 0x1ba   :  { %280 = dma.vmem_to_hbm [thread:$0]  %s275_s10, 128, %s644_s5, [#allocation4], %s509_s0, %s509_s0, %s510_s25   ;;  %v234_v51 = vsub.f32 %v225_v50, %v316_v42 }
 0x1bb   :  { %s514_s19 = smov [#allocation8]   ;;  %s515_s21 = smov [#allocation10]  }
 0x1bc   :  { %v259_v52 = vmul.f32 %v234_v51, %v234_v51  ;;  %v252_v53 = vrot.slane %v234_v51, 4  ;;  %s287_s20 = sshll.u32 %s514_s19, 4  ;;  %s297_s22 = sshll.u32 %s515_s21, 4  ;;  %s288_s20 = int_to_ptr.vmem [resolvable:$true] %s287_s20  ;;  %s607_s22 = int_to_ptr.vmem [resolvable:$true] %s297_s22 }
 0x1bd   :  { %s453_s5 = scalar_lea.vmem %s288_s20, 16  ;;  %s457_s23 = scalar_lea.vmem %s288_s20, 32 }
 0x1be   :  { %v253_v54 = vadd.f32 %v252_v53, %v234_v51  ;;  %v262_v55 = vrot.slane %v259_v52, 4  ;;  %p454_p10 = scmp.ne.s32.totalorder %s288_s20, %s453_s5  ;;  %p458_p11 = scmp.lt.s32.totalorder %s288_s20, %s288_s20 }
 0x1bf   :  { %p459_p12 = scmp.lt.s32.totalorder %s457_s23, %s453_s5 }
 0x1c0   :  { %v254_v56 = vrot.slane %v253_v54, 2  ;;  %v263_v57 = vadd.f32 %v262_v55, %v259_v52 }
 0x1c1   :  { %p460_p13 = por %p459_p12, %p458_p11 }
 0x1c2   :  { %v255_v58 = vadd.f32 %v254_v56, %v253_v54  ;;  %v264_v59 = vrot.slane %v263_v57, 2 }
 0x1c3   :  { %p461_p0 = pnand %p460_p13, %p454_p10 }
 0x1c4   :  { %v256_v60 = vrot.slane %v255_v58, 1  ;;  %v265_v61 = vadd.f32 %v264_v59, %v263_v57 }
 0x1c6   :  { %v257_v62 = vadd.f32 %v256_v60, %v255_v58  ;;  %v266_v63 = vrot.slane %v265_v61, 1 }
 0x1c8   :  { %258 = vst [vmem:[#allocation8] sm:$0x1] %v257_v62  ;;  %v267_v0 = vadd.f32 %v266_v63, %v265_v61 }
 0x1c9   :  { %464 = shalt.err (!%p461_p0)
}
 0x1ca   :  { %s465_s25 = scalar_lea.hbm %s645_s6, 16 }
 0x1cb   :  { %p466_p1 = scmp.ne.s32.totalorder %s645_s6, %s465_s25  ;;  %p469_p2 = scmp.lt.u32.totalorder %s465_s25, %s645_s6 }
 0x1cd   :  { %p471_p3 = pnand %p469_p2, %p466_p1 }
 0x1cf   :  { %474 = shalt.err (!%p471_p3)
}
 0x1d0   :  { %290 = dma.vmem_to_hbm [thread:$0]  %s288_s20, 16, %s645_s6, [#allocation9]   ;;  %268 = vst [vmem:[#allocation10] sm:$0x1] %v267_v0 }
 0x1d1   :  { %s475_s8 = scalar_lea.vmem %s607_s22, 16  ;;  %s479_s9 = scalar_lea.vmem %s607_s22, 32 }
 0x1d2   :  { %p476_p4 = scmp.ne.s32.totalorder %s607_s22, %s475_s8  ;;  %p480_p5 = scmp.lt.s32.totalorder %s607_s22, %s607_s22 }
 0x1d3   :  { %p481_p6 = scmp.lt.s32.totalorder %s479_s9, %s475_s8 }
 0x1d5   :  { %p482_p7 = por %p481_p6, %p480_p5 }
 0x1d7   :  { %p483_p8 = pnand %p482_p7, %p476_p4 }
 0x1d9   :  { %486 = shalt.err (!%p483_p8)
}
 0x1da   :  { %s487_s2 = scalar_lea.hbm %s646_s7, 16 }
 0x1db   :  { %p488_p9 = scmp.ne.s32.totalorder %s646_s7, %s487_s2  ;;  %p491_p10 = scmp.lt.u32.totalorder %s487_s2, %s646_s7 }
 0x1dd   :  { %p493_p11 = pnand %p491_p10, %p488_p9 }
 0x1df   :  { %496 = shalt.err (!%p493_p11)
}
 0x1e0   :  { %300 = dma.vmem_to_hbm [thread:$0]  %s607_s22, 16, %s646_s7, [#allocation9]  }
 0x1e1   :  { %501 = dma.done.wait [#allocation4], 128  }
 0x1e2   :  { %502 = vsyncadd [#allocation4], 4294967168 }
 0x1e3   :  { %503 = dma.done.wait [#allocation9], 32  }
 0x1e4   :  { %504 = vsyncadd [#allocation9], 4294967264 }
 0x1e5   :  { %310 = vsyncpa [#allocation3], 1 }
 0x1e6   :  { %311 = vsyncpa [#allocation6], 1 }
 0x1e7   :  { %312 = vsyncpa [#allocation4], 1 }
 0x1e8   :  { %313 = vsyncpa [#allocation9], 1 }

// kernel: tpu_custom_call.1
= control target key start
LH: loop header
LB: loop body
LE: loop exit
PB: predicated region body
PF: predicated region fallthrough
CT: control target
= control target key end

     0   :  { %13 = vsyncpa [#allocation3], 0  ;;  %s639_s0 = inlined_call_operand.hbm [shape: f32[16,128], index: 0, kind: input, shape index: {}]   ;;  %s640_s1 = inlined_call_operand.vmem [shape: f32[1,128], index: 1, kind: input, shape index: {}]   ;;  %s641_s2 = inlined_call_operand.vmem [shape: f32[1,128], index: 2, kind: input, shape index: {}]   ;;  %s642_s3 = inlined_call_operand.hbm [shape: bf16[128,128], index: 3, kind: input, shape index: {}]   ;;  %s643_s4 = inlined_call_operand.vmem [shape: f32[1,128], index: 4, kind: input, shape index: {}]   ;;  %s644_s5 = inlined_call_operand.hbm [shape: bf16[16,128], index: 5, kind: output, shape index: {0}]   ;;  %s645_s6 = inlined_call_operand.hbm [shape: f32[1,1,128], index: 6, kind: output, shape index: {1}]   ;;  %s646_s7 = inlined_call_operand.hbm [shape: f32[1,1,128], index: 7, kind: output, shape index: {2}]  }
   0x1   :  { %14 = vsyncpa [#allocation6], 0 }
   0x2   :  { %15 = vsyncpa [#allocation4], 0 }
   0x3   :  { %16 = vsyncpa [#allocation9], 0  ;;  %s505_s24 = smov [#allocation2]   ;;  %s387_s28 = scalar_lea.hbm %s639_s0, 256 }
   0x4   :  { %s22_s25 = sshll.u32 %s505_s24, 4  ;;  %p388_p0 = scmp.ne.s32.totalorder %s639_s0, %s387_s28  ;;  %s23_s25 = int_to_ptr.vmem [resolvable:$true] %s22_s25 }
   0x5   :  { %p391_p1 = scmp.lt.u32.totalorder %s387_s28, %s639_s0 }
   0x7   :  { %p393_p2 = pnand %p391_p1, %p388_p0 }
   0x9   :  { %396 = shalt.err (!%p393_p2)
}
   0xa   :  { %s397_s10 = scalar_lea.vmem %s23_s25, 256  ;;  %p402_p4 = scmp.lt.s32.totalorder %s23_s25, %s23_s25 }
   0xb   :  { %p398_p3 = scmp.ne.s32.totalorder %s23_s25, %s397_s10  ;;  %p403_p5 = scmp.lt.s32.totalorder %s397_s10, %s397_s10 }
   0xd   :  { %p404_p6 = por %p403_p5, %p402_p4 }
   0xf   :  { %p405_p7 = pnand %p404_p6, %p398_p3 }
  0x11   :  { %408 = shalt.err (!%p405_p7)
}
  0x12   :  { %s506_s11 = smov 128   ;;  %s507_s12 = smov 8  }
  0x13   :  { %28 = dma.hbm_to_vmem [thread:$0]  %s639_s0, 256, %s23_s25, [#allocation3], %s506_s11, %s506_s11, %s507_s12  }
  0x14   :  { %s508_s15 = smov [#allocation5]   ;;  %s409_s19 = scalar_lea.hbm %s642_s3, 1024 }
  0x15   :  { %s38_s16 = sshll.u32 %s508_s15, 4  ;;  %p410_p8 = scmp.ne.s32.totalorder %s642_s3, %s409_s19  ;;  %s39_s16 = int_to_ptr.vmem [resolvable:$true] %s38_s16 }
  0x16   :  { %p413_p9 = scmp.lt.u32.totalorder %s409_s19, %s642_s3 }
  0x18   :  { %p415_p10 = pnand %p413_p9, %p410_p8 }
  0x1a   :  { %418 = shalt.err (!%p415_p10)
}
  0x1b   :  { %s419_s24 = scalar_lea.vmem %s39_s16, 1024  ;;  %p424_p12 = scmp.lt.s32.totalorder %s39_s16, %s39_s16 }
  0x1c   :  { %p420_p11 = scmp.ne.s32.totalorder %s39_s16, %s419_s24  ;;  %p425_p13 = scmp.lt.s32.totalorder %s419_s24, %s419_s24 }
  0x1e   :  { %p426_p0 = por %p425_p13, %p424_p12 }
  0x20   :  { %p427_p1 = pnand %p426_p0, %p420_p11 }
  0x22   :  { %430 = shalt.err (!%p427_p1)
}
  0x23   :  { %s509_s0 = smov 64   ;;  %s510_s25 = smov 4  }
  0x24   :  { %44 = dma.hbm_to_vmem [thread:$0]  %s642_s3, 1024, %s39_s16, [#allocation6], %s509_s0, %s509_s0, %s510_s25  }
  0x25   :  { %497 = dma.done.wait [#allocation3], 256  }
  0x26   :  { %498 = vsyncadd [#allocation3], 4294967040 }
  0x27   :  { %499 = dma.done.wait [#allocation6], 1024  }
  0x28   :  { %500 = vsyncadd [#allocation6], 4294966272  ;;  %v54_v0 = vld [vmem:[#allocation2] sm:$0xff]  ;;  %v55_v1 = vld [vmem:[#allocation2 + $0x8] sm:$0xff]  ;;  %v511_v5 = vmov 0.0   ;;  %vm512_vm0 = vmmov 0  }
  0x29   :  { %56 = vadd.xlane.f32.xlu0 %v54_v0  ;;  %v60_v2 = vmul.f32 %v54_v0, %v54_v0  ;;  %v61_v3 = vmul.f32 %v55_v1, %v55_v1  ;;  %v375_v4 = vld [vmem:[#allocation5] sm:$0xff]   ;;  %344 = vmatprep.subr.bf16.mxu0 %v511_v5  ;;  %v376_v6 = vld [vmem:[#allocation5 + $0x8] sm:$0xff]   ;;  %v377_v7 = vld [vmem:[#allocation5 + $0x10] sm:$0xff]  }
  0x2a   :  { %345 = vmatpush3.bf16.msra.mxu0 %v375_v4  ;;  %v378_v8 = vld [vmem:[#allocation5 + $0x18] sm:$0xff]   ;;  %v379_v9 = vld [vmem:[#allocation5 + $0x20] sm:$0xff]   ;;  %360 = vmatprep.mubr.msk.bf16.mxu0 %vm512_vm0, %v511_v5  ;;  %v380_v10 = vld [vmem:[#allocation5 + $0x28] sm:$0xff]  }
  0x2b   :  { %62 = vadd.xlane.f32.xlu1 %v60_v2  ;;  %346 = vmatprep.subr.bf16.mxu0 %v511_v5  ;;  %v381_v11 = vld [vmem:[#allocation5 + $0x30] sm:$0xff]   ;;  %v382_v12 = vld [vmem:[#allocation5 + $0x38] sm:$0xff]  }
  0x2c   :  { %v314_v32 = vld [vmem:[%s640_s1] ss:$0 sm:$0xff]  ;;  %s513_s1 = smov [#allocation7]  }
  0x2d   :  { %58 = vadd.xlane.f32.xlu0 %v55_v1  ;;  %v315_v37 = vld [vmem:[%s641_s2] ss:$0 sm:$0xff]  ;;  %s274_s10 = sshll.u32 %s513_s1, 4  ;;  %s275_s10 = int_to_ptr.vmem [resolvable:$true] %s274_s10 }
  0x2e   :  { %347 = vmatpush3.bf16.msra.mxu0 %v376_v6  ;;  %v316_v42 = vld [vmem:[%s643_s4] ss:$0 sm:$0xff]  ;;  %s431_s2 = scalar_lea.vmem %s275_s10, 128  ;;  %p436_p3 = scmp.lt.s32.totalorder %s275_s10, %s275_s10 }
  0x2f   :  { %64 = vadd.xlane.f32.xlu1 %v61_v3  ;;  %348 = vmatprep.subr.bf16.mxu0 %v511_v5  ;;  %p432_p2 = scmp.ne.s32.totalorder %s275_s10, %s431_s2  ;;  %p437_p4 = scmp.lt.s32.totalorder %s431_s2, %s431_s2 }
  0x31   :  { %p438_p5 = por %p437_p4, %p436_p3 }
  0x32   :  { %349 = vmatpush3.bf16.msra.mxu0 %v377_v7 }
  0x33   :  { %350 = vmatprep.subr.bf16.mxu0 %v511_v5  ;;  %p439_p6 = pnand %p438_p5, %p432_p2 }
  0x36   :  { %351 = vmatpush3.bf16.msra.mxu0 %v378_v8 }
  0x37   :  { %352 = vmatprep.subr.bf16.mxu0 %v511_v5 }
  0x3a   :  { %353 = vmatpush3.bf16.msra.mxu0 %v379_v9 }
  0x3b   :  { %354 = vmatprep.subr.bf16.mxu0 %v511_v5 }
  0x3e   :  { %355 = vmatpush3.bf16.msra.mxu0 %v380_v10 }
  0x3f   :  { %356 = vmatprep.subr.bf16.mxu0 %v511_v5 }
  0x42   :  { %357 = vmatpush3.bf16.msra.mxu0 %v381_v11 }
  0x43   :  { %358 = vmatprep.subr.bf16.mxu0 %v511_v5 }
  0x46   :  { %359 = vmatpush3.bf16.msra.mxu0 %v382_v12 }
  0xb6   :  { %v57_v13 = vpop.xlane.xlu0 %56 }
  0xb7   :  { %v66_v14 = vmul.f32 0.03125, %v57_v13 }
  0xb8   :  { %v63_v15 = vpop.xlane.xlu1 %62 }
  0xb9   :  { %v70_v16 = vmul.f32 %v66_v14, %v66_v14  ;;  %v68_v17 = vmul.f32 0.03125, %v63_v15  ;;  %v76_v29 = vsub.f32 %v54_v0, %v66_v14 }
  0xba   :  { %v59_v18 = vpop.xlane.xlu0 %58 }
  0xbb   :  { %v72_v19 = vsub.f32 %v68_v17, %v70_v16  ;;  %v67_v20 = vmul.f32 0.03125, %v59_v18 }
  0xbc   :  { %v65_v21 = vpop.xlane.xlu1 %64 }
  0xbd   :  { %v74_v22 = vmax.f32 %v72_v19, 0.0  ;;  %v71_v23 = vmul.f32 %v67_v20, %v67_v20  ;;  %v69_v24 = vmul.f32 0.03125, %v65_v21  ;;  %v77_v33 = vsub.f32 %v55_v1, %v67_v20 }
  0xbf   :  { %v78_v25 = vadd.f32 1e-05, %v74_v22  ;;  %v73_v26 = vsub.f32 %v69_v24, %v71_v23 }
  0xc1   :  { %383 = vrsqrt.f32 %v78_v25  ;;  %v75_v27 = vmax.f32 %v73_v26, 0.0 }
  0xc3   :  { %v79_v28 = vadd.f32 1e-05, %v75_v27 }
  0xc5   :  { %385 = vrsqrt.f32 %v79_v28 }
  0xcb   :  { %v384_v30 = vpop.eup %383 }
  0xcc   :  { %v82_v31 = vmul.f32 %v384_v30, %v76_v29 }
  0xce   :  { %v91_v36 = vmul.f32 %v314_v32, %v82_v31 }
  0xcf   :  { %v386_v34 = vpop.eup %385 }
  0xd0   :  { %v83_v35 = vmul.f32 %v386_v34, %v77_v33  ;;  %v100_v39 = vadd.f32 %v315_v37, %v91_v36 }
  0xd2   :  { %v92_v38 = vmul.f32 %v314_v32, %v83_v35 }
  0xd4   :  { %v101_v40 = vadd.f32 %v315_v37, %v92_v38 }
  0xd6   :  { %v102_v41 = vpack.c.bf16 %v101_v40, %v100_v39 }
  0xd8   :  { %361 = vmatmul.mubr.bf16.vlgmr.msra.gmra.mrb[0].mxu0 %v102_v41 }
 0x1ab   :  { %v208_v43 = vpop.f32.mrb[0].mxu0 }
 0x1ac   :  { %v362_v44 = vpop.f32.mrb[1].mxu0  ;;  %v209_v46 = vadd.f32 %v316_v42, %v208_v43 }
 0x1ad   :  { %v211_v45 = vpop.f32.mrb[2].mxu0 }
 0x1ae   :  { %v212_v47 = vadd.f32 %v316_v42, %v211_v45  ;;  %v363_v48 = vpop.f32.mrb[3].mxu0 }
 0x1b0   :  { %v215_v49 = vpack.c.bf16 %v212_v47, %v209_v46 }
 0x1b2   :  { %v225_v50 = vunpack.c.l.bf16 %v215_v49  ;;  %334 = vst [vmem:[#allocation7] sm:$0xff] %v215_v49  }
 0x1b3   :  { %442 = shalt.err (!%p439_p6)
}
 0x1b4   :  { %s443_s12 = scalar_lea.hbm %s644_s5, 128 }
 0x1b5   :  { %p444_p7 = scmp.ne.s32.totalorder %s644_s5, %s443_s12  ;;  %p447_p8 = scmp.lt.u32.totalorder %s443_s12, %s644_s5 }
 0x1b7   :  { %p449_p9 = pnand %p447_p8, %p444_p7 }
 0x1b9   :  { %452 = shalt.err (!%p449_p9)
}
 0x1ba   :  { %280 = dma.vmem_to_hbm [thread:$0]  %s275_s10, 128, %s644_s5, [#allocation4], %s509_s0, %s509_s0, %s510_s25   ;;  %v234_v51 = vsub.f32 %v225_v50, %v316_v42 }
 0x1bb   :  { %s514_s19 = smov [#allocation8]   ;;  %s515_s21 = smov [#allocation10]  }
 0x1bc   :  { %v259_v52 = vmul.f32 %v234_v51, %v234_v51  ;;  %v252_v53 = vrot.slane %v234_v51, 4  ;;  %s287_s20 = sshll.u32 %s514_s19, 4  ;;  %s297_s22 = sshll.u32 %s515_s21, 4  ;;  %s288_s20 = int_to_ptr.vmem [resolvable:$true] %s287_s20  ;;  %s607_s22 = int_to_ptr.vmem [resolvable:$true] %s297_s22 }
 0x1bd   :  { %s453_s5 = scalar_lea.vmem %s288_s20, 16  ;;  %s457_s23 = scalar_lea.vmem %s288_s20, 32 }
 0x1be   :  { %v253_v54 = vadd.f32 %v252_v53, %v234_v51  ;;  %v262_v55 = vrot.slane %v259_v52, 4  ;;  %p454_p10 = scmp.ne.s32.totalorder %s288_s20, %s453_s5  ;;  %p458_p11 = scmp.lt.s32.totalorder %s288_s20, %s288_s20 }
 0x1bf   :  { %p459_p12 = scmp.lt.s32.totalorder %s457_s23, %s453_s5 }
 0x1c0   :  { %v254_v56 = vrot.slane %v253_v54, 2  ;;  %v263_v57 = vadd.f32 %v262_v55, %v259_v52 }
 0x1c1   :  { %p460_p13 = por %p459_p12, %p458_p11 }
 0x1c2   :  { %v255_v58 = vadd.f32 %v254_v56, %v253_v54  ;;  %v264_v59 = vrot.slane %v263_v57, 2 }
 0x1c3   :  { %p461_p0 = pnand %p460_p13, %p454_p10 }
 0x1c4   :  { %v256_v60 = vrot.slane %v255_v58, 1  ;;  %v265_v61 = vadd.f32 %v264_v59, %v263_v57 }
 0x1c6   :  { %v257_v62 = vadd.f32 %v256_v60, %v255_v58  ;;  %v266_v63 = vrot.slane %v265_v61, 1 }
 0x1c8   :  { %258 = vst [vmem:[#allocation8] sm:$0x1] %v257_v62  ;;  %v267_v0 = vadd.f32 %v266_v63, %v265_v61 }
 0x1c9   :  { %464 = shalt.err (!%p461_p0)
}
 0x1ca   :  { %s465_s25 = scalar_lea.hbm %s645_s6, 16 }
 0x1cb   :  { %p466_p1 = scmp.ne.s32.totalorder %s645_s6, %s465_s25  ;;  %p469_p2 = scmp.lt.u32.totalorder %s465_s25, %s645_s6 }
 0x1cd   :  { %p471_p3 = pnand %p469_p2, %p466_p1 }
 0x1cf   :  { %474 = shalt.err (!%p471_p3)
}
 0x1d0   :  { %290 = dma.vmem_to_hbm [thread:$0]  %s288_s20, 16, %s645_s6, [#allocation9]   ;;  %268 = vst [vmem:[#allocation10] sm:$0x1] %v267_v0 }
 0x1d1   :  { %s475_s8 = scalar_lea.vmem %s607_s22, 16  ;;  %s479_s9 = scalar_lea.vmem %s607_s22, 32 }
 0x1d2   :  { %p476_p4 = scmp.ne.s32.totalorder %s607_s22, %s475_s8  ;;  %p480_p5 = scmp.lt.s32.totalorder %s607_s22, %s607_s22 }
 0x1d3   :  { %p481_p6 = scmp.lt.s32.totalorder %s479_s9, %s475_s8 }
 0x1d5   :  { %p482_p7 = por %p481_p6, %p480_p5 }
 0x1d7   :  { %p483_p8 = pnand %p482_p7, %p476_p4 }
 0x1d9   :  { %486 = shalt.err (!%p483_p8)
}
 0x1da   :  { %s487_s2 = scalar_lea.hbm %s646_s7, 16 }
 0x1db   :  { %p488_p9 = scmp.ne.s32.totalorder %s646_s7, %s487_s2  ;;  %p491_p10 = scmp.lt.u32.totalorder %s487_s2, %s646_s7 }
 0x1dd   :  { %p493_p11 = pnand %p491_p10, %p488_p9 }
 0x1df   :  { %496 = shalt.err (!%p493_p11)
}
 0x1e0   :  { %300 = dma.vmem_to_hbm [thread:$0]  %s607_s22, 16, %s646_s7, [#allocation9]  }
 0x1e1   :  { %501 = dma.done.wait [#allocation4], 128  }
 0x1e2   :  { %502 = vsyncadd [#allocation4], 4294967168 }
 0x1e3   :  { %503 = dma.done.wait [#allocation9], 32  }
 0x1e4   :  { %504 = vsyncadd [#allocation9], 4294967264 }
 0x1e5   :  { %310 = vsyncpa [#allocation3], 1 }
 0x1e6   :  { %311 = vsyncpa [#allocation6], 1 }
 0x1e7   :  { %312 = vsyncpa [#allocation4], 1 }
 0x1e8   :  { %313 = vsyncpa [#allocation9], 1 }

</bundles_post_ra>
